<compile_context>
chip_gen: v6e
topology: v6e:2x2x1
jax: 0.10.0
libtpu: 0.0.40
codegen_flags: <defaults>
</compile_context>

<pallas_src>
import functools

import jax
import jax.numpy as jnp
from jax.experimental import pallas as pl
from jax.experimental.pallas import tpu as pltpu
import numpy as np


def attentive_pool_kernel(x_ref, w_score_ref, w_mlp_ref, shift_ref, o_ref, *, K):
    # x_ref:       (1, C, tile_n*K)   native-layout input tile, lane axis = flattened (n, k)
    # w_score_ref: (C, C)             score Linear weight transposed (logits = x @ W^T)
    # w_mlp_ref:   (C_out, C)         1x1 conv weight with BN scale folded in
    # shift_ref:   (C_out, 1)         fused conv-bias + BN shift
    # o_ref:       (1, C_out, tile_n) lane-dense output tile (lane = points)
    C = x_ref.shape[1]
    tile_nk = x_ref.shape[2]
    tn = tile_nk // K

    # Channels-first lane-dense block -> channels-last; single XLU relayout per grid
    # step, hidden under the (HBM-bound) input DMA for the next step.
    x_cl = jnp.transpose(x_ref[0])                                   # (tile_nk, C)

    # --- attention scores: Linear(C -> C, no bias) ---
    logits = jnp.dot(x_cl, w_score_ref[...],
                     preferred_element_type=jnp.float32)             # (tile_nk, C)

    # K == 8/16 (multiple of the sublane count) keeps these reshapes layout-preserving.
    # TODO(synk): for K % 8 != 0 the reshape materializes a relayout; padding K in the
    # wrapper (with masking of the padded neighbors in the softmax) would avoid it.
    x3 = x_cl.reshape(tn, K, C)
    logits = logits.reshape(tn, K, C)

    # --- softmax over K fused with the pooling: never materialize e / denom ---
    m = jnp.max(logits, axis=1, keepdims=True)                       # (tn, 1, C)
    e = jnp.exp(logits - m)                                          # (tn, K, C)
    denom = jnp.sum(e, axis=1)                                       # (tn, C)
    numer = jnp.sum(e * x3, axis=1)                                  # (tn, C)
    feats = numer / denom                                            # one divide on (tn, C)

    # --- SharedMLP: 1x1 conv (BN scale folded into weights) + fused shift + ReLU ---
    # Contract both operands on their C dim so the MXU emits (C_out, tn) directly:
    # lane-dense store, no XLU transpose competing with the K-axis reductions.
    y = jax.lax.dot_general(w_mlp_ref[...], feats,
                            (((1,), (1,)), ((), ())),
                            preferred_element_type=jnp.float32)      # (C_out, tn)
    y = jnp.maximum(y + shift_ref[...], 0.0)
    o_ref[0] = y.astype(o_ref.dtype)


def _working_set_bytes(tile_n, K, C, c_out):
    """Per-step VMEM estimate: double-buffered in/out blocks + live f32 temps."""
    per_row = ((2 + 4) * K * C * 4        # 2x input block + (x_cl, logits, e, e*x) temps
               + 2 * c_out * 4            # 2x output block
               + (3 * C + c_out) * 4)     # numer / denom / feats / y rows
    weights = (C * C + c_out * C + c_out) * 4
    return tile_n * per_row + weights


def _choose_tile_n(B, N, K, C, c_out):
    """Row-tile size + explicit scoped-VMEM limit, sized per TPU generation."""
    try:
        vmem_cap = pltpu.get_tpu_info().vmem_capacity_bytes
    except Exception:
        vmem_cap = 64 * 1024 * 1024      # conservative (v7x-sized) fallback
    budget = vmem_cap // 4               # leave headroom for Mosaic scratch / pipelining

    def valid(t):
        # Last-dim legality: input lane dim t*K and output lane dim t must be 128
        # multiples unless the block spans the full axis (t == N).
        return t == N or t % 128 == 0

    divisors = [d for d in range(N, 0, -1) if N % d == 0]
    fitting = [t for t in divisors
               if valid(t) and _working_set_bytes(t, K, C, c_out) <= budget]
    if fitting:
        tile_n = fitting[0]              # largest fitting tile
    else:
        # No tile fits the budget: clamp to the smallest legal tile instead of
        # silently returning full N; vmem_limit below is raised to cover it.
        # TODO(synk): very large K*C would want a K-split grid axis with a running softmax.
        legal = [t for t in divisors if valid(t)]
        tile_n = legal[-1]

    # v7x megacore: make sure the parallel grid exposes >= 2 programs when possible.
    if B * (N // tile_n) < 2:
        smaller = [t for t in fitting if t <= N // 2]
        if smaller:
            tile_n = smaller[0]

    ws = _working_set_bytes(tile_n, K, C, c_out)
    vmem_limit = int(min(max(32 * 1024 * 1024, 2 * ws), vmem_cap * 3 // 4))
    return tile_n, vmem_limit


def attentive_pooling(x, params, eps=1e-6):
    """x: (B, C_in, N, K) float32 (PyTorch NCHW). Returns (B, C_out, N, 1)."""
    B, C, N, K = x.shape
    c_out = params["conv_w"].shape[0]

    # Contiguous metadata-only reshape — no transpose, no extra HBM pass over x.
    x_flat = x.reshape(B, C, N * K)

    # Score Linear: logits = x @ W^T (W is (C, C), no bias); transposing the tiny weight
    # in the wrapper is negligible and keeps the in-kernel matmul a plain A @ B.
    w_score_t = jnp.transpose(params["score_w"])                      # (C, C)

    # Fold BN (inference) + conv bias: scale into the conv weight, rest into one shift.
    scale = params["bn_gamma"] / jnp.sqrt(params["bn_var"] + eps)     # (C_out,)
    w_mlp = params["conv_w"].reshape(c_out, C) * scale[:, None]       # (C_out, C), BN-scaled
    shift = ((params["conv_b"] - params["bn_mean"]) * scale
             + params["bn_beta"]).reshape(c_out, 1)                   # (C_out, 1)

    tile_n, vmem_limit = _choose_tile_n(B, N, K, C, c_out)
    tile_nk = tile_n * K
    grid = (N // tile_n, B)   # row tiles lead so megacore shards points even for tiny B

    kernel = functools.partial(attentive_pool_kernel, K=K)

    out = pl.pallas_call(
        kernel,
        out_shape=jax.ShapeDtypeStruct((B, c_out, N), jnp.float32),
        grid_spec=pltpu.PrefetchScalarGridSpec(
            num_scalar_prefetch=0,
            grid=grid,
            in_specs=[
                pl.BlockSpec((1, C, tile_nk), lambda t, b: (b, 0, t)),  # x (native layout)
                pl.BlockSpec((C, C), lambda t, b: (0, 0)),              # score W^T
                pl.BlockSpec((c_out, C), lambda t, b: (0, 0)),          # conv W * bn_scale
                pl.BlockSpec((c_out, 1), lambda t, b: (0, 0)),          # fused shift
            ],
            out_specs=pl.BlockSpec((1, c_out, tile_n), lambda t, b: (b, 0, t)),
        ),
        compiler_params=pltpu.CompilerParams(
            dimension_semantics=("parallel", "parallel"),
            vmem_limit_bytes=vmem_limit),
    )(x_flat, w_score_t, w_mlp, shift)

    # (B, C_out, N) -> (B, C_out, N, 1): pure reshape, no extra HBM pass.
    # TODO(synk): bf16 input/weight DMA (f32 accumulate) would halve HBM traffic but is
    # gated on the 1e-4 accuracy requirement, so it is not enabled here.
    return out[..., None]


def reference(x, params, eps=1e-6):
    """Pure-JAX reference mirroring the PyTorch forward (inference-mode BN)."""
    B, C, N, K = x.shape
    c_out = params["conv_w"].shape[0]
    xp = jnp.transpose(x, (0, 2, 3, 1))                                     # (B,N,K,C)
    logits = jnp.einsum("bnkc,dc->bnkd", xp, params["score_w"])             # Linear, no bias
    scores = jax.nn.softmax(logits, axis=-2)                                # softmax over K
    scores = jnp.transpose(scores, (0, 3, 1, 2))                            # (B,C,N,K)
    feats = jnp.sum(scores * x, axis=-1, keepdims=True)                     # (B,C,N,1)
    Wm = params["conv_w"].reshape(c_out, C)
    y = jnp.einsum("bcnk,dc->bdnk", feats, Wm) + params["conv_b"][None, :, None, None]
    scale = params["bn_gamma"] / jnp.sqrt(params["bn_var"] + eps)
    y = ((y - params["bn_mean"][None, :, None, None]) * scale[None, :, None, None]
         + params["bn_beta"][None, :, None, None])
    return jnp.maximum(y, 0.0)                                              # (B,C_out,N,1)


if __name__ == "__main__":
    B, C_in, C_out, N, K = 2, 16, 32, 16, 8

    key = jax.random.PRNGKey(0)
    ks = jax.random.split(key, 8)

    x = jax.random.normal(ks[0], (B, C_in, N, K), dtype=jnp.float32)

    # Deterministic synthetic parameters: Linear(C_in, C_in, bias=False),
    # Conv2d(C_in, C_out, 1) + BatchNorm2d(C_out, eps=1e-6) (inference running stats).
    params = {
        "score_w": 0.1 * jax.random.normal(ks[1], (C_in, C_in), dtype=jnp.float32),
        "conv_w": 0.1 * jax.random.normal(ks[2], (C_out, C_in, 1, 1), dtype=jnp.float32),
        "conv_b": 0.05 * jax.random.normal(ks[3], (C_out,), dtype=jnp.float32),
        "bn_gamma": 0.5 + jax.random.uniform(ks[4], (C_out,), dtype=jnp.float32),
        "bn_beta": 0.1 * jax.random.normal(ks[5], (C_out,), dtype=jnp.float32),
        "bn_mean": 0.1 * jax.random.normal(ks[6], (C_out,), dtype=jnp.float32),
        "bn_var": 0.5 + jax.random.uniform(ks[7], (C_out,), dtype=jnp.float32),
    }

    out = attentive_pooling(x, params)
    out = jax.block_until_ready(out)

    ref = reference(x, params)
    assert out.shape == (B, C_out, N, 1), out.shape
    np.testing.assert_allclose(np.asarray(out), np.asarray(ref), atol=1e-4, rtol=1e-4)

    print("KERNEL_OK")
</pallas_src>

<mosaic_0001>
module attributes {stable_mosaic.version = 11 : i64} {
  func.func @attentive_pool_kernel(%arg0: i32, %arg1: i32, %arg2: memref<1x16x128xf32, #tpu.memory_space<vmem>>, %arg3: memref<16x16xf32, #tpu.memory_space<vmem>>, %arg4: memref<32x16xf32, #tpu.memory_space<vmem>>, %arg5: memref<32x1xf32, #tpu.memory_space<vmem>>, %arg6: memref<1x32x16xf32, #tpu.memory_space<vmem>>) attributes {dimension_semantics = [#tpu.dimension_semantics<parallel>, #tpu.dimension_semantics<parallel>], iteration_bounds = array<i64: 1, 2>, scalar_prefetch = 0 : i64, scratch_operands = 0 : i64, tpu.core_type = #tpu.core_type<tc>, window_params = [{transform_indices = @transform_0, window_bounds = array<i64: 1, 16, 128>}, {pipeline_mode = #tpu.pipeline_mode<synchronous>, transform_indices = @transform_1, window_bounds = array<i64: 16, 16>}, {pipeline_mode = #tpu.pipeline_mode<synchronous>, transform_indices = @transform_2, window_bounds = array<i64: 32, 16>}, {pipeline_mode = #tpu.pipeline_mode<synchronous>, transform_indices = @transform_3, window_bounds = array<i64: 32, 1>}, {transform_indices = @transform_4, window_bounds = array<i64: 1, 32, 16>}]} {
    %c0 = arith.constant 0 : index
    %c0_0 = arith.constant 0 : index
    %c0_1 = arith.constant 0 : index
    %0 = vector.load %arg2[%c0, %c0_0, %c0_1] : memref<1x16x128xf32, #tpu.memory_space<vmem>>, vector<1x16x128xf32>
    %1 = vector.shape_cast %0 : vector<1x16x128xf32> to vector<16x128xf32>
    %2 = tpu.transpose %1, [1, 0] : vector<16x128xf32> -> vector<128x16xf32>
    %c0_2 = arith.constant 0 : index
    %c0_3 = arith.constant 0 : index
    %3 = vector.load %arg3[%c0_2, %c0_3] : memref<16x16xf32, #tpu.memory_space<vmem>>, vector<16x16xf32>
    %cst = arith.constant dense<0.000000e+00> : vector<128x16xf32>
    %4 = tpu.matmul %2, %3, %cst {dimension_numbers = #tpu.dot_dimension_numbers<[1], [0], [0], [1], [0, 0, 1, 1], [], []>} : vector<128x16xf32>, vector<16x16xf32>, vector<128x16xf32> -> vector<128x16xf32>
    %5 = vector.shape_cast %2 : vector<128x16xf32> to vector<16x8x16xf32>
    %6 = vector.shape_cast %4 : vector<128x16xf32> to vector<16x8x16xf32>
    %cst_4 = arith.constant dense<0xFF800000> : vector<16x16xf32>
    %7 = vector.multi_reduction <maximumf>, %6, %cst_4 [1] : vector<16x8x16xf32> to vector<16x16xf32>
    %8 = vector.shape_cast %7 : vector<16x16xf32> to vector<16x1x16xf32>
    %9 = vector.broadcast %8 : vector<16x1x16xf32> to vector<16x8x16xf32>
    %10 = arith.subf %6, %9 : vector<16x8x16xf32>
    %11 = math.exp %10 : vector<16x8x16xf32>
    %cst_5 = arith.constant dense<0.000000e+00> : vector<16x16xf32>
    %12 = vector.multi_reduction <add>, %11, %cst_5 [1] : vector<16x8x16xf32> to vector<16x16xf32>
    %13 = arith.mulf %11, %5 : vector<16x8x16xf32>
    %cst_6 = arith.constant dense<0.000000e+00> : vector<16x16xf32>
    %14 = vector.multi_reduction <add>, %13, %cst_6 [1] : vector<16x8x16xf32> to vector<16x16xf32>
    %15 = arith.divf %14, %12 : vector<16x16xf32>
    %c0_7 = arith.constant 0 : index
    %c0_8 = arith.constant 0 : index
    %16 = vector.load %arg4[%c0_7, %c0_8] : memref<32x16xf32, #tpu.memory_space<vmem>>, vector<32x16xf32>
    %cst_9 = arith.constant dense<0.000000e+00> : vector<32x16xf32>
    %17 = tpu.matmul %16, %15, %cst_9 {dimension_numbers = #tpu.dot_dimension_numbers<[1], [1], [0], [0], [0, 0, 1, 0], [], []>} : vector<32x16xf32>, vector<16x16xf32>, vector<32x16xf32> -> vector<32x16xf32>
    %c0_10 = arith.constant 0 : index
    %c0_11 = arith.constant 0 : index
    %18 = vector.load %arg5[%c0_10, %c0_11] : memref<32x1xf32, #tpu.memory_space<vmem>>, vector<32x1xf32>
    %19 = vector.broadcast %18 : vector<32x1xf32> to vector<32x16xf32>
    %20 = arith.addf %17, %19 : vector<32x16xf32>
    %cst_12 = arith.constant 0.000000e+00 : f32
    %21 = vector.broadcast %cst_12 : f32 to vector<32x16xf32>
    %22 = arith.maximumf %20, %21 : vector<32x16xf32>
    %c0_13 = arith.constant 0 : index
    %c0_14 = arith.constant 0 : index
    %c0_15 = arith.constant 0 : index
    %23 = vector.load %arg6[%c0_13, %c0_14, %c0_15] : memref<1x32x16xf32, #tpu.memory_space<vmem>>, vector<1x32x16xf32>
    %24 = vector.shape_cast %23 : vector<1x32x16xf32> to vector<32x16xf32>
    %25 = vector.shape_cast %22 : vector<32x16xf32> to vector<1x32x16xf32>
    tpu.vector_store %arg6[%c0_13, %c0_14, %c0_15], %25 {strides = array<i32>} : memref<1x32x16xf32, #tpu.memory_space<vmem>>, vector<1x32x16xf32>,
    return
  }
  func.func @transform_0(%arg0: i32, %arg1: i32) -> (i32, i32, i32) {
    %c0_i32 = arith.constant 0 : i32
    %c0_i32_0 = arith.constant 0 : i32
    return %arg1, %c0_i32, %arg0 : i32, i32, i32
  }
  func.func @transform_1(%arg0: i32, %arg1: i32) -> (i32, i32) {
    %c0_i32 = arith.constant 0 : i32
    %c0_i32_0 = arith.constant 0 : i32
    %c0_i32_1 = arith.constant 0 : i32
    return %c0_i32, %c0_i32_0 : i32, i32
  }
  func.func @transform_2(%arg0: i32, %arg1: i32) -> (i32, i32) {
    %c0_i32 = arith.constant 0 : i32
    %c0_i32_0 = arith.constant 0 : i32
    %c0_i32_1 = arith.constant 0 : i32
    return %c0_i32, %c0_i32_0 : i32, i32
  }
  func.func @transform_3(%arg0: i32, %arg1: i32) -> (i32, i32) {
    %c0_i32 = arith.constant 0 : i32
    %c0_i32_0 = arith.constant 0 : i32
    %c0_i32_1 = arith.constant 0 : i32
    return %c0_i32, %c0_i32_0 : i32, i32
  }
  func.func @transform_4(%arg0: i32, %arg1: i32) -> (i32, i32, i32) {
    %c0_i32 = arith.constant 0 : i32
    %c0_i32_0 = arith.constant 0 : i32
    return %arg1, %c0_i32, %arg0 : i32, i32, i32
  }
}

</mosaic_0001>

<bundles_post_ra>
// kernel: tpu_custom_call.1
= control target key start
LH: loop header
LB: loop body
LE: loop exit
PB: predicated region body
PF: predicated region fallthrough
CT: control target
= control target key end

     0   :  { %s1391_s15 = smov 0   ;;  %s1393_s16 = smov 0   ;;  %s1785_s0 = inlined_call_operand.vmem [shape: f32[2,16,128], index: 0, kind: input, shape index: {}]   ;;  %s1786_s1 = inlined_call_operand.vmem [shape: f32[16,16], index: 1, kind: input, shape index: {}]   ;;  %s1787_s2 = inlined_call_operand.vmem [shape: f32[32,16], index: 2, kind: input, shape index: {}]   ;;  %s1788_s3 = inlined_call_operand.vmem [shape: f32[32,1], index: 3, kind: input, shape index: {}]   ;;  %s1789_s4 = inlined_call_operand.vmem [shape: f32[2,32,16], index: 4, kind: output, shape index: {}]  }
   0x1   :  { %s1395_s17 = smov 0  }
   0x2 LB: > { %s23_s18 = sadd.s32 1, %s1359_s16  ;;  %p1152_p0 = scmp.ge.s32.totalorder %s1363_s17, 1  ;;  %s1363_s17 = sphi %s1395_s17, %s14_s17   ;;  %s1359_s16 = sphi %s1393_s16, %s1791_s16   ;;  %s1355_s15 = sphi %s1391_s15, %s1790_s15  }
   0x3   : > { %p24_p1 = scmp.ge.s32.totalorder %s23_s18, 2  ;;  %p181_p2 = scmp.lt.s32.totalorder %s1363_s17, 3 }
   0x5   : > { %s1793_s18 = smov (%p24_p1, %s23_s18), 0  ;;  %p182_p3 = pnand %p1152_p0, %p181_p2 }
   0x6   : > { %p213_p4 = scmp.lt.s32.totalorder (!%p182_p3), %s1355_s15, 1 }
   0x7   : > { %185 = sbr.rel (%p182_p3) target bundleno = 680 (0x2a8), region = 36 }
   0xc   : > { %s1795_s15 = smov (!%p213_p4, %s1355_s15), 1  ;;  %v264_v0 = vld [vmem:[%s1786_s1 + $0x8] sm:$0xff]  ;;  %v263_v1 = vld [vmem:[%s1786_s1] sm:$0xff]  ;;  %vm265_vm0 = vcmask 130048   ;;  %vm935_vm1 = vcmask 1041409   ;;  %vm937_vm2 = vcmask 1042434  }
   0xd   : > { %s1181_s21 = sshll.u32 %s1795_s15, 4  ;;  %1207 = vmatprep.subr.mxu0 %v264_v0  ;;  %1245 = vmatprep.subr.mxu1 %v264_v0  ;;  %v891_v53 = vld [vmem:[%s1787_s2] sm:$0xff]  ;;  %vm939_vm3 = vcmask 1043459   ;;  %vm941_vm4 = vcmask 1044484   ;;  %vm943_vm5 = vcmask 1045509   ;;  %vm945_vm6 = vcmask 1046534  }
   0xe   : > { %s220_s26 = scalar_lea.vmem %s1785_s0, %s1181_s21  ;;  %1208 = vmatpush3.msra.mxu0 %v264_v0  ;;  %1247 = vmatpush3.msra.mxu1 %v264_v0  ;;  %vm947_vm7 = vcmask 1047559   ;;  %s1182_s21 = sshll.u32 %s1795_s15, 5 }
   0xf   : > { %v229_v2 = vld [vmem:[%s220_s26] sm:$0xff]  ;;  %1209 = vmatprep.subr.mxu0 %v263_v1  ;;  %1246 = vmatprep.subr.mxu1 %v263_v1  ;;  %v230_v3 = vld [vmem:[%s220_s26 + $0x8] sm:$0xff]  ;;  %s228_s24 = scalar_lea.vmem %s1789_s4, %s1182_s21 }
  0x10   : > { %231 = vxpose.xlu0.b32.start [1/2] (short) %v229_v2, 128  ;;  %1210 = vmatpush3.msra.mxu0 %v263_v1 }
  0x11   : > { %1248 = vmatpush3.msra.mxu1 %v263_v1 }
  0x14   : > { %232 = vxpose.xlu0.b32.end [2/2] (short) %v230_v3, 128 }
  0x8c   : > { %v1421_v4 = vpop.trf.xlu0 }
  0x8d   : > { %1211 = vmatprep.mubr.msk.f32.mxu0 %vm265_vm0, %v1421_v4 }
  0x90   : > { %v1425_v5 = vpop.trf.xlu0 }
  0x91   : > { %1212 = vmatmul.mubr.msk.f32.vlgmr.msra.gmra.mxu0 %vm265_vm0, %v1425_v5 }
  0x94   : > { %v1429_v6 = vpop.trf.xlu0 }
  0x95   : > { %1214 = vmatprep.mubr.msk.f32.mxu0 %vm265_vm0, %v1429_v6 }
  0x98   : > { %v1433_v7 = vpop.trf.xlu0 }
  0x99   : > { %1215 = vmatmul.mubr.msk.f32.gmra.mxu0 %vm265_vm0, %v1433_v7 }
  0x9c   : > { %v1437_v8 = vpop.trf.xlu0 }
  0x9d   : > { %1217 = vmatprep.mubr.msk.f32.mxu0 %vm265_vm0, %v1437_v8 }
  0xa0   : > { %v1441_v9 = vpop.trf.xlu0 }
  0xa1   : > { %1218 = vmatmul.mubr.msk.f32.gmra.mxu0 %vm265_vm0, %v1441_v9 }
  0xa4   : > { %v1445_v10 = vpop.trf.xlu0 }
  0xa5   : > { %1220 = vmatprep.mubr.msk.f32.mxu0 %vm265_vm0, %v1445_v10 }
  0xa8   : > { %v1449_v11 = vpop.trf.xlu0 }
  0xa9   : > { %1221 = vmatmul.mubr.msk.f32.gmra.mxu0 %vm265_vm0, %v1449_v11 }
  0xac   : > { %v1453_v12 = vpop.trf.xlu0 }
  0xad   : > { %1223 = vmatprep.mubr.msk.f32.mxu0 %vm265_vm0, %v1453_v12 }
  0xb0   : > { %v1457_v13 = vpop.trf.xlu0 }
  0xb1   : > { %1224 = vmatmul.mubr.msk.f32.gmra.mxu0 %vm265_vm0, %v1457_v13 }
  0xb4   : > { %v1461_v14 = vpop.trf.xlu0 }
  0xb5   : > { %1226 = vmatprep.mubr.msk.f32.mxu1 %vm265_vm0, %v1461_v14 }
  0xb8   : > { %v1465_v15 = vpop.trf.xlu0 }
  0xb9   : > { %1227 = vmatmul.mubr.msk.f32.vlgmr.msra.gmra.mxu1 %vm265_vm0, %v1465_v15 }
  0xbc   : > { %v1469_v16 = vpop.trf.xlu0 }
  0xbd   : > { %1229 = vmatprep.mubr.msk.f32.mxu1 %vm265_vm0, %v1469_v16 }
  0xc0   : > { %v1473_v17 = vpop.trf.xlu0 }
  0xc1   : > { %1230 = vmatmul.mubr.msk.f32.gmra.mxu1 %vm265_vm0, %v1473_v17 }
  0xc4   : > { %v1477_v18 = vpop.trf.xlu0 }
  0xc5   : > { %1232 = vmatprep.mubr.msk.f32.mxu1 %vm265_vm0, %v1477_v18 }
  0xc8   : > { %v1481_v19 = vpop.trf.xlu0 }
  0xc9   : > { %1233 = vmatmul.mubr.msk.f32.gmra.mxu1 %vm265_vm0, %v1481_v19 }
  0xca   : > { %1239 = vmatprep.mubr.msk.f32.mxu1 %vm265_vm0, %v891_v53 }
 0x151   : > { %v1213_v20 = vpop.f32.mrf.mxu0 }
 0x152   : > { %v466_v21 = vsel %vm265_vm0, %v1213_v20, -inf }
 0x153   : > { %v467_v22 = vrot.slane %v466_v21, 4  ;;  %v380_v23 = vpop.f32.mrf.mxu0 }
 0x154   : > { %v459_v24 = vsel %vm265_vm0, %v380_v23, -inf }
 0x155   : > { %v468_v25 = vmax.f32 %v466_v21, %v467_v22  ;;  %v460_v26 = vrot.slane %v459_v24, 4  ;;  %v895_v21 = vld [vmem:[%s1788_s3] sm:$0xff] }
 0x157   : > { %v469_v27 = vrot.slane %v468_v25, 2  ;;  %v461_v28 = vmax.f32 %v459_v24, %v460_v26  ;;  %v1365_v24 = vmov 0  }
 0x158   : > { %1275 = vset.pattern.permute.xlu1 %v1365_v24  ;;  %1276 = vset.pattern.permute.xlu0 %v1365_v24 }
 0x159   : > { %v470_v29 = vmax.f32 %v468_v25, %v469_v27  ;;  %v1487_v30 = vpop.f32.mrf.mxu0  ;;  %v462_v31 = vrot.slane %v461_v28, 2  ;;  %v897_v25 = vld [vmem:[%s1788_s3 + $0x10] sm:$0xff]  ;;  %901 = vperm.xlu1 %1275, %v895_v21  }
 0x15a   : > { %v480_v33 = vsel %vm265_vm0, %v1487_v30, -inf  ;;  %911 = vperm.xlu0 %1276, %v897_v25  }
 0x15b   : > { %v471_v32 = vrot.slane %v470_v29, 1  ;;  %v1491_v34 = vpop.f32.mrf.mxu0  ;;  %v463_v35 = vmax.f32 %v461_v28, %v462_v31  ;;  %v481_v36 = vrot.slane %v480_v33, 4  ;;  %v896_v28 = vld [vmem:[%s1788_s3 + $0x8] sm:$0xff] }
 0x15c   : > { %v473_v37 = vsel %vm265_vm0, %v1491_v34, -inf }
 0x15d   : > { %v472_v39 = vmax.f32 %v470_v29, %v471_v32  ;;  %v464_v40 = vrot.slane %v463_v35, 1  ;;  %v474_v43 = vrot.slane %v473_v37, 4  ;;  %v482_v45 = vmax.f32 %v480_v33, %v481_v36  ;;  %906 = vperm.xlu1 %1275, %v896_v28  }
 0x15f   : > { %v572_v46 = vsub.f32 %v1213_v20, %v472_v39  ;;  %v465_v48 = vmax.f32 %v463_v35, %v464_v40  ;;  %v475_v50 = vmax.f32 %v473_v37, %v474_v43  ;;  %v483_v51 = vrot.slane %v482_v45, 2  ;;  %v898_v37 = vld [vmem:[%s1788_s3 + $0x18] sm:$0xff] }
 0x161   : > { %v1495_v38 = vpop.f32.mrf.mxu0  ;;  %v589_v54 = vmul.f32 1.442695, %v572_v46  ;;  %v571_v57 = vsub.f32 %v380_v23, %v465_v48  ;;  %v476_v60 = vrot.slane %v475_v50, 2  ;;  %v484_v61 = vmax.f32 %v482_v45, %v483_v51  ;;  %916 = vperm.xlu1 %1275, %v898_v37  }
 0x162   : > { %v494_v41 = vsel %vm265_vm0, %v1495_v38, -inf }
 0x163   : > { %v1499_v42 = vpop.f32.mrf.mxu0  ;;  %v495_v47 = vrot.slane %v494_v41, 4  ;;  %1277 = vpow2.f32 %v589_v54  ;;  %v587_v1 = vmul.f32 1.442695, %v571_v57  ;;  %v477_v3 = vmax.f32 %v475_v50, %v476_v60 }
 0x164   : > { %v487_v44 = vsel %vm265_vm0, %v1499_v42, -inf  ;;  %v485_v22 = vrot.slane %v484_v61, 1 }
 0x165   : > { %v488_v49 = vrot.slane %v487_v44, 4  ;;  %v496_v55 = vmax.f32 %v494_v41, %v495_v47  ;;  %1279 = vpow2.f32 %v587_v1  ;;  %v478_v29 = vrot.slane %v477_v3, 1 }
 0x166   : > { %v486_v32 = vmax.f32 %v484_v61, %v485_v22 }
 0x167   : > { %v489_v58 = vmax.f32 %v487_v44, %v488_v49  ;;  %v497_v0 = vrot.slane %v496_v55, 2  ;;  %v479_v39 = vmax.f32 %v477_v3, %v478_v29 }
 0x168   : > { %v574_v43 = vsub.f32 %v1487_v30, %v486_v32 }
 0x169   : > { %v1503_v52 = vpop.f32.mrf.mxu0  ;;  %v490_v2 = vrot.slane %v489_v58, 2  ;;  %v498_v26 = vmax.f32 %v496_v55, %v497_v0  ;;  %v573_v49 = vsub.f32 %v1491_v34, %v479_v39 }
 0x16a   : > { %v508_v56 = vsel %vm265_vm0, %v1503_v52, -inf  ;;  %v593_v51 = vmul.f32 1.442695, %v574_v43 }
 0x16b   : > { %v1511_v59 = vpop.f32.mrf.mxu0  ;;  %v509_v62 = vrot.slane %v508_v56, 4  ;;  %v491_v27 = vmax.f32 %v489_v58, %v490_v2  ;;  %v499_v35 = vrot.slane %v498_v26, 1  ;;  %v591_v60 = vmul.f32 1.442695, %v573_v49 }
 0x16c   : > { %v501_v63 = vsel %vm265_vm0, %v1511_v59, -inf  ;;  %1281 = vpow2.f32 %v593_v51 }
 0x16d   : > { %v502_v20 = vrot.slane %v501_v63, 4  ;;  %v510_v23 = vmax.f32 %v508_v56, %v509_v62  ;;  %v492_v36 = vrot.slane %v491_v27, 1  ;;  %v500_v45 = vmax.f32 %v498_v26, %v499_v35 }
 0x16e   : > { %1283 = vpow2.f32 %v591_v60 }
 0x16f   : > { %v503_v31 = vmax.f32 %v501_v63, %v502_v20  ;;  %v511_v33 = vrot.slane %v510_v23, 2  ;;  %v493_v47 = vmax.f32 %v491_v27, %v492_v36  ;;  %v576_v56 = vsub.f32 %v1495_v38, %v500_v45 }
 0x170   : > { %v1278_v46 = vpop.eup %1277 }
 0x171   : > { %v504_v40 = vrot.slane %v503_v31, 2  ;;  %v1527_v41 = vpop.f32.mrf.mxu0  ;;  %v512_v44 = vmax.f32 %v510_v23, %v511_v33  ;;  %v626_v54 = vsel %vm265_vm0, %v1278_v46, 0.0  ;;  %v732_v55 = vmul.f32 %v1278_v46, %v1425_v5 }
 0x172   : > { %v522_v48 = vsel %vm265_vm0, %v1527_v41, -inf  ;;  %v575_v57 = vsub.f32 %v1499_v42, %v493_v47  ;;  %v1280_v58 = vpop.eup %1279  ;;  %v627_v62 = vrot.slane %v626_v54, 4  ;;  %v597_v1 = vmul.f32 1.442695, %v576_v56 }
 0x173   : > { %v505_v50 = vmax.f32 %v503_v31, %v504_v40  ;;  %v513_v53 = vrot.slane %v512_v44, 1  ;;  %v523_v30 = vrot.slane %v522_v48, 4  ;;  %v754_v34 = vsel %vm265_vm0, %v732_v55, 0.0  ;;  %v1540_v3 = vpop.f32.mrf.mxu0 }
 0x174   : > { %v619_v5 = vsel %vm265_vm0, %v1280_v58, 0.0  ;;  %v731_v38 = vmul.f32 %v1280_v58, %v1421_v4  ;;  %v595_v20 = vmul.f32 1.442695, %v575_v57  ;;  %v628_v21 = vadd.f32 %v627_v62, %v626_v54 }
 0x175   : > { %v506_v61 = vrot.slane %v505_v50, 1  ;;  %v514_v63 = vmax.f32 %v512_v44, %v513_v53  ;;  %v524_v2 = vmax.f32 %v522_v48, %v523_v30  ;;  %v755_v22 = vrot.slane %v754_v34, 4 }
 0x176   : > { %v515_v24 = vsel %vm265_vm0, %v1540_v3, -inf  ;;  %v620_v26 = vrot.slane %v619_v5, 4  ;;  %1285 = vpow2.f32 %v597_v1  ;;  %v747_v28 = vsel %vm265_vm0, %v731_v38, 0.0 }
 0x177   : > { %v507_v42 = vmax.f32 %v505_v50, %v506_v61  ;;  %v578_v23 = vsub.f32 %v1503_v52, %v514_v63  ;;  %v525_v27 = vrot.slane %v524_v2, 2  ;;  %1287 = vpow2.f32 %v595_v20 }
 0x178   : > { %v516_v32 = vrot.slane %v515_v24, 4  ;;  %v629_v33 = vrot.slane %v628_v21, 2  ;;  %v756_v35 = vadd.f32 %v755_v22, %v754_v34  ;;  %v621_v39 = vadd.f32 %v620_v26, %v619_v5 }
 0x179   : > { %v1537_v0 = vpop.f32.mrf.mxu1  ;;  %v577_v4 = vsub.f32 %v1511_v59, %v507_v42  ;;  %v526_v31 = vmax.f32 %v524_v2, %v525_v27  ;;  %v601_v36 = vmul.f32 1.442695, %v578_v23  ;;  %v748_v45 = vrot.slane %v747_v28, 4  ;;  %v1282_v60 = vpop.eup %1281 }
 0x17a   : > { %v536_v52 = vsel %vm265_vm0, %v1537_v0, -inf  ;;  %v517_v43 = vmax.f32 %v515_v24, %v516_v32  ;;  %v1564_v61 = vadd.f32 %v629_v33, %v628_v21  ;;  %v757_v62 = vrot.slane %v756_v35, 2 }
 0x17b   : > { %v1547_v25 = vpop.f32.mrf.mxu1  ;;  %v537_v37 = vrot.slane %v536_v52, 4  ;;  %v527_v40 = vrot.slane %v526_v31, 1  ;;  %v599_v49 = vmul.f32 1.442695, %v577_v4  ;;  %1289 = vpow2.f32 %v601_v36  ;;  %v1284_v38 = vpop.eup %1283 }
 0x17c   : > { %v529_v44 = vsel %vm265_vm0, %v1547_v25, -inf  ;;  %v518_v51 = vrot.slane %v517_v43, 2  ;;  %v622_v34 = vrot.slane %v621_v39, 2  ;;  %v1566_v1 = vadd.f32 %v748_v45, %v747_v28 }
 0x17d   : > { %v538_v46 = vmax.f32 %v536_v52, %v537_v37  ;;  %v530_v47 = vrot.slane %v529_v44, 4  ;;  %v528_v50 = vmax.f32 %v526_v31, %v527_v40  ;;  %1291 = vpow2.f32 %v599_v49 }
 0x17e   : > { %v519_v30 = vmax.f32 %v517_v43, %v518_v51  ;;  %v640_v23 = vsel %vm265_vm0, %v1282_v60, 0.0  ;;  %v1572_v24 = vmul.f32 %v1282_v60, %v1433_v7  ;;  %v631_v33 = vrot.slane %v1564_v61, 1 }
 0x17f   : > { %v539_v54 = vrot.slane %v538_v46, 2  ;;  %v531_v55 = vmax.f32 %v529_v44, %v530_v47  ;;  %v580_v56 = vsub.f32 %v1527_v41, %v528_v50  ;;  %v1581_v36 = vadd.f32 %v757_v62, %v756_v35 }
 0x180   : > { %v520_v2 = vrot.slane %v519_v30, 1  ;;  %v1584_v40 = vadd.f32 %v622_v34, %v621_v39  ;;  %v633_v43 = vsel %vm265_vm0, %v1284_v38, 0.0  ;;  %v641_v50 = vrot.slane %v640_v23, 4 }
 0x181   : > { %v1550_v29 = vpop.f32.mrf.mxu1  ;;  %v540_v63 = vmax.f32 %v538_v46, %v539_v54  ;;  %v532_v41 = vrot.slane %v531_v55, 2  ;;  %v605_v21 = vmul.f32 1.442695, %v580_v56  ;;  %v634_v56 = vrot.slane %v633_v43, 4 }
 0x182   : > { %v550_v59 = vsel %vm265_vm0, %v1550_v29, -inf  ;;  %v521_v26 = vmax.f32 %v519_v30, %v520_v2  ;;  %v733_v30 = vmul.f32 %v1284_v38, %v1429_v6  ;;  %v642_v2 = vadd.f32 %v641_v50, %v640_v23 }
 0x183   : > { %v1559_v48 = vpop.f32.mrf.mxu1  ;;  %v551_v53 = vrot.slane %v550_v59, 4  ;;  %v541_v20 = vrot.slane %v540_v63, 1  ;;  %v1574_v27 = vpop.eup %1285  ;;  %v533_v28 = vmax.f32 %v531_v55, %v532_v41  ;;  %1293 = vpow2.f32 %v605_v21 }
 0x184   : > { %v543_v58 = vsel %vm265_vm0, %v1559_v48, -inf  ;;  %v1578_v52 = vpop.eup %1287  ;;  %v579_v37 = vsub.f32 %v1540_v3, %v521_v26  ;;  %v654_v46 = vsel %vm265_vm0, %v1574_v27, 0.0  ;;  %v635_v26 = vadd.f32 %v634_v56, %v633_v43 }
 0x185   : > { %v552_v57 = vmax.f32 %v550_v59, %v551_v53  ;;  %v544_v22 = vrot.slane %v543_v58, 4  ;;  %v542_v7 = vmax.f32 %v540_v63, %v541_v20  ;;  %v534_v44 = vrot.slane %v533_v28, 1 }
 0x186   : > { %v603_v47 = vmul.f32 1.442695, %v579_v37  ;;  %v647_v35 = vsel %vm265_vm0, %v1578_v52, 0.0  ;;  %v643_v37 = vrot.slane %v642_v2, 2  ;;  %v768_v43 = vsel %vm265_vm0, %v1572_v24, 0.0 }
 0x187   : > { %v553_v42 = vrot.slane %v552_v57, 2  ;;  %v545_v31 = vmax.f32 %v543_v58, %v544_v22  ;;  %v535_v51 = vmax.f32 %v533_v28, %v534_v44  ;;  %v582_v39 = vsub.f32 %v1537_v0, %v542_v7 }
 0x188   : > { %v1596_v60 = vpop.eup %1289  ;;  %1295 = vpow2.f32 %v603_v47  ;;  %v648_v20 = vrot.slane %v647_v35, 4  ;;  %v761_v7 = vsel %vm265_vm0, %v733_v30, 0.0  ;;  %v644_v30 = vadd.f32 %v643_v37, %v642_v2 }
 0x189   : > { %v1568_v5 = vpop.f32.mrf.mxu1  ;;  %v554_v4 = vmax.f32 %v552_v57, %v553_v42  ;;  %v546_v59 = vrot.slane %v545_v31, 2  ;;  %v655_v57 = vrot.slane %v654_v46, 4  ;;  %v581_v58 = vsub.f32 %v1547_v25, %v535_v51 }
 0x18a   : > { %v564_v32 = vsel %vm265_vm0, %v1568_v5, -inf  ;;  %v609_v42 = vmul.f32 1.442695, %v582_v39  ;;  %v1601_v38 = vpop.eup %1291  ;;  %v750_v25 = vrot.slane %v1566_v1, 2 }
 0x18b   : > { %v555_v45 = vrot.slane %v554_v4, 1  ;;  %v565_v49 = vrot.slane %v564_v32, 4  ;;  %v1591_v3 = vpop.f32.mrf.mxu1  ;;  %v547_v54 = vmax.f32 %v545_v31, %v546_v59  ;;  %v607_v0 = vmul.f32 1.442695, %v581_v58 }
 0x18c   : > { %v557_v34 = vsel %vm265_vm0, %v1591_v3, -inf  ;;  %v668_v31 = vsel %vm265_vm0, %v1596_v60, 0.0  ;;  %v661_v50 = vsel %vm265_vm0, %v1601_v38, 0.0  ;;  %v624_v58 = vrot.slane %v1584_v40, 1 }
 0x18d   : > { %v556_v53 = vmax.f32 %v554_v4, %v555_v45  ;;  %v566_v55 = vmax.f32 %v564_v32, %v565_v49  ;;  %v548_v62 = vrot.slane %v547_v54, 1  ;;  %v558_v41 = vrot.slane %v557_v34, 4 }
 0x18e   : > { %1297 = vpow2.f32 %v607_v0  ;;  %v656_v4 = vadd.f32 %v655_v57, %v654_v46  ;;  %v636_v49 = vrot.slane %v635_v26, 2  ;;  %v669_v46 = vrot.slane %v668_v31, 4 }
 0x18f   : > { %v567_v63 = vrot.slane %v566_v55, 2  ;;  %v584_v22 = vsub.f32 %v1550_v29, %v556_v53  ;;  %v549_v21 = vmax.f32 %v547_v54, %v548_v62  ;;  %v559_v28 = vmax.f32 %v557_v34, %v558_v41 }
 0x190   : > { %v649_v29 = vadd.f32 %v648_v20, %v647_v35  ;;  %1299 = vpow2.f32 %v609_v42  ;;  %v657_v51 = vrot.slane %v656_v4, 2  ;;  %v759_v35 = vrot.slane %v1581_v36, 1  ;;  %v1615_v56 = vpop.eup %1293 }
 0x191   : > { %v568_v6 = vmax.f32 %v566_v55, %v567_v63  ;;  %v583_v23 = vsub.f32 %v1559_v48, %v549_v21  ;;  %v560_v44 = vrot.slane %v559_v28, 2  ;;  %v613_v45 = vmul.f32 1.442695, %v584_v22 }
 0x192   : > { %v632_v48 = vadd.f32 %v631_v33, %v1564_v61  ;;  %v762_v53 = vrot.slane %v761_v7, 4  ;;  %v650_v54 = vrot.slane %v649_v29, 2  ;;  %v662_v24 = vrot.slane %v661_v50, 4 }
 0x193   : > { %v569_v32 = vrot.slane %v568_v6, 1  ;;  %v611_v47 = vmul.f32 1.442695, %v583_v23  ;;  %v561_v55 = vmax.f32 %v559_v28, %v560_v44  ;;  %v1619_v62 = vadd.f32 %v750_v25, %v1566_v1 }
 0x194   : > { %v637_v61 = vadd.f32 %v636_v49, %v635_v26  ;;  %v670_v33 = vadd.f32 %v669_v46, %v668_v31  ;;  %v769_v63 = vrot.slane %v768_v43, 4  ;;  %v735_v34 = vmul.f32 %v1578_v52, %v1437_v8 }
 0x195   : > { %v570_v59 = vmax.f32 %v568_v6, %v569_v32  ;;  %1301 = vpow2.f32 %v611_v47  ;;  %v1296_v20 = vpop.eup %1295  ;;  %v763_v0 = vadd.f32 %v762_v53, %v761_v7  ;;  %v651_v41 = vadd.f32 %v650_v54, %v649_v29 }
 0x196   : > { %1303 = vpow2.f32 %v613_v45  ;;  %v682_v2 = vsel %vm265_vm0, %v1615_v56, 0.0  ;;  %v562_v42 = vrot.slane %v561_v55, 1  ;;  %v645_v22 = vrot.slane %v644_v30, 1 }
 0x197   : > { %v586_v39 = vsub.f32 %v1568_v5, %v570_v59  ;;  %v658_v5 = vadd.f32 %v657_v51, %v656_v4  ;;  %v736_v1 = vmul.f32 %v1574_v27, %v1441_v9  ;;  %v663_v21 = vadd.f32 %v662_v24, %v661_v50 }
 0x198   : > { %v625_v6 = vadd.f32 %v624_v58, %v1584_v40  ;;  %v752_v25 = vrot.slane %v1619_v62, 1  ;;  %v638_v26 = vrot.slane %v637_v61, 1  ;;  %v671_v8 = vrot.slane %v670_v33, 2 }
 0x199   : > { %v617_v57 = vmul.f32 1.442695, %v586_v39  ;;  %v659_v28 = vrot.slane %v658_v5, 1  ;;  %v775_v4 = vsel %vm265_vm0, %v735_v34, 0.0  ;;  %v683_v31 = vrot.slane %v682_v2, 4 }
 0x19a   : > { %v675_v23 = vsel %vm265_vm0, %v1296_v20, 0.0  ;;  %v1633_v32 = vadd.f32 %v769_v63, %v768_v43  ;;  %v764_v37 = vrot.slane %v763_v0, 2  ;;  %v652_v7 = vrot.slane %v651_v41, 1 }
 0x19b   : > { %1305 = vpow2.f32 %v617_v57  ;;  %v1629_v52 = vpop.eup %1297  ;;  %v563_v9 = vmax.f32 %v561_v55, %v562_v42  ;;  %v646_v27 = vadd.f32 %v645_v22, %v644_v30  ;;  %v1636_v40 = vsel %vm265_vm0, %v736_v1, 0.0 }
 0x19c   : > { %1307 = vrcp.f32 %v632_v48  ;;  %v664_v29 = vrot.slane %v663_v21, 2  ;;  %v689_v44 = vsel %vm265_vm0, %v1629_v52, 0.0  ;;  %v639_v47 = vadd.f32 %v638_v26, %v637_v61 }
 0x19d   : > { %v1300_v45 = vpop.eup %1299  ;;  %v776_v59 = vrot.slane %v775_v4, 4  ;;  %v672_v49 = vadd.f32 %v671_v8, %v670_v33  ;;  %v676_v46 = vrot.slane %v675_v23, 4  ;;  %1309 = vrcp.f32 %v625_v6 }
 0x19e   : > { %v660_v50 = vadd.f32 %v659_v28, %v658_v5  ;;  %v684_v43 = vadd.f32 %v683_v31, %v682_v2  ;;  %v690_v48 = vrot.slane %v689_v44, 4  ;;  %v771_v39 = vrot.slane %v1633_v32, 2 }
 0x19f   : > { %v765_v53 = vadd.f32 %v764_v37, %v763_v0  ;;  %v653_v54 = vadd.f32 %v652_v7, %v651_v41  ;;  %v585_v55 = vsub.f32 %v1591_v3, %v563_v9  ;;  %1311 = vrcp.f32 %v646_v27 }
 0x1a0   : > { %v783_v30 = vrot.slane %v1636_v40, 4  ;;  %v665_v24 = vadd.f32 %v664_v29, %v663_v21  ;;  %v696_v57 = vsel %vm265_vm0, %v1300_v45, 0.0  ;;  %1313 = vrcp.f32 %v639_v47 }
 0x1a1   : > { %v1648_v61 = vadd.f32 %v776_v59, %v775_v4  ;;  %v673_v33 = vrot.slane %v672_v49, 1  ;;  %v677_v63 = vadd.f32 %v676_v46, %v675_v23  ;;  %1315 = vrcp.f32 %v660_v50 }
 0x1a2   : > { %v1640_v51 = vpop.eup %1301  ;;  %v685_v5 = vrot.slane %v684_v43, 2  ;;  %v691_v34 = vadd.f32 %v690_v48, %v689_v44  ;;  %1317 = vrcp.f32 %v653_v54  ;;  %v1656_v41 = vmul.f32 %v1596_v60, %v1449_v11 }
 0x1a3   : > { %v1646_v58 = vpop.eup %1303  ;;  %v703_v0 = vsel %vm265_vm0, %v1640_v51, 0.0  ;;  %v697_v2 = vrot.slane %v696_v57, 4  ;;  %v615_v42 = vmul.f32 1.442695, %v585_v55  ;;  %v666_v22 = vrot.slane %v665_v24, 1 }
 0x1a4   : > { %v739_v1 = vmul.f32 %v1296_v20, %v1453_v12  ;;  %v710_v21 = vsel %vm265_vm0, %v1646_v58, 0.0  ;;  %v704_v6 = vrot.slane %v703_v0, 4  ;;  %v1663_v8 = vadd.f32 %v673_v33, %v672_v49 }
 0x1a5   : > { %v737_v28 = vmul.f32 %v1601_v38, %v1445_v10  ;;  %v678_v4 = vrot.slane %v677_v63, 2  ;;  %v1668_v11 = vadd.f32 %v752_v25, %v1619_v62  ;;  %v686_v60 = vadd.f32 %v685_v5, %v684_v43 }
 0x1a6   : > { %v692_v31 = vrot.slane %v691_v34, 2  ;;  %v705_v23 = vadd.f32 %v704_v6, %v703_v0  ;;  %v740_v20 = vmul.f32 %v1615_v56, %v1457_v13  ;;  %v698_v37 = vadd.f32 %v697_v2, %v696_v57 }
 0x1a7   : > { %v711_v7 = vrot.slane %v710_v21, 4  ;;  %1319 = vpow2.f32 %v615_v42  ;;  %v667_v9 = vadd.f32 %v666_v22, %v665_v24  ;;  %v803_v27 = vsel %vm265_vm0, %v739_v1, 0.0 }
 0x1a8   : > { %v1652_v3 = vpop.eup %1305  ;;  %v741_v10 = vmul.f32 %v1629_v52, %v1461_v14  ;;  %v766_v38 = vrot.slane %v765_v53, 1  ;;  %v679_v62 = vadd.f32 %v678_v4, %v677_v63  ;;  %v742_v25 = vmul.f32 %v1300_v45, %v1465_v15 }
 0x1a9   : > { %v1661_v26 = vpop.eup %1307  ;;  %v724_v12 = vsel %vm265_vm0, %v1652_v3, 0.0  ;;  %v1681_v44 = vadd.f32 %v759_v35, %v1581_v36  ;;  %v687_v13 = vrot.slane %v686_v60, 1  ;;  %v693_v56 = vadd.f32 %v692_v31, %v691_v34 }
 0x1aa   : > { %v725_v29 = vrot.slane %v724_v12, 4  ;;  %v706_v47 = vrot.slane %v705_v23, 2  ;;  %v1684_v59 = vadd.f32 %v771_v39, %v1633_v32  ;;  %v1686_v49 = vpop.eup %1309  ;;  %v810_v14 = vsel %vm265_vm0, %v740_v20, 0.0 }
 0x1ab   : > { %v804_v52 = vrot.slane %v803_v27, 4  ;;  %v699_v46 = vrot.slane %v698_v37, 2  ;;  %v712_v50 = vadd.f32 %v711_v7, %v710_v21  ;;  %1321 = vrcp.f32 %v667_v9 }
 0x1ac   : > { %v817_v15 = vsel %vm265_vm0, %v741_v10, 0.0  ;;  %v1690_v45 = vadd.f32 %v766_v38, %v765_v53  ;;  %v778_v36 = vrot.slane %v1648_v61, 2  ;;  %v1693_v35 = vpop.eup %1311  ;;  %v680_v43 = vrot.slane %v679_v62, 1 }
 0x1ad   : > { %v824_v32 = vsel %vm265_vm0, %v742_v25, 0.0  ;;  %v743_v48 = vmul.f32 %v1640_v51, %v1469_v16  ;;  %v726_v39 = vadd.f32 %v725_v29, %v724_v12  ;;  %v1698_v54 = vpop.eup %1313  ;;  %v688_v55 = vadd.f32 %v687_v13, %v686_v60 }
 0x1ae   : > { %v811_v24 = vrot.slane %v810_v14, 4  ;;  %v694_v57 = vrot.slane %v693_v56, 1  ;;  %v707_v33 = vadd.f32 %v706_v47, %v705_v23  ;;  %v1700_v63 = vpop.eup %1315  ;;  %v805_v53 = vadd.f32 %v804_v52, %v803_v27 }
 0x1af   : > { %v700_v5 = vadd.f32 %v699_v46, %v698_v37  ;;  %v818_v34 = vrot.slane %v817_v15, 4  ;;  %v713_v0 = vrot.slane %v712_v50, 2  ;;  %v1702_v2 = vpop.eup %1317  ;;  %v825_v42 = vrot.slane %v824_v32, 4 }
 0x1b0   : > { %v744_v22 = vmul.f32 %v1646_v58, %v1473_v17  ;;  %v773_v16 = vrot.slane %v1684_v59, 1  ;;  %v1710_v51 = vadd.f32 %v783_v30, %v1636_v40  ;;  %v681_v1 = vadd.f32 %v680_v43, %v679_v62 }
 0x1b1   : > { %v831_v21 = vsel %vm265_vm0, %v743_v48, 0.0  ;;  %v727_v6 = vrot.slane %v726_v39, 2  ;;  %v789_v4 = vsel %vm265_vm0, %v737_v28, 0.0  ;;  %v812_v60 = vadd.f32 %v811_v24, %v810_v14 }
 0x1b2   : > { %1323 = vrcp.f32 %v688_v55  ;;  %v695_v31 = vadd.f32 %v694_v57, %v693_v56  ;;  %v708_v23 = vrot.slane %v707_v33, 1  ;;  %v806_v12 = vrot.slane %v805_v53, 2 }
 0x1b3   : > { %v701_v20 = vrot.slane %v700_v5, 1  ;;  %v819_v17 = vadd.f32 %v818_v34, %v817_v15  ;;  %v714_v58 = vadd.f32 %v713_v0, %v712_v50  ;;  %v826_v7 = vadd.f32 %v825_v42, %v824_v32 }
 0x1b4   : > { %v1320_v37 = vpop.eup %1319  ;;  %v838_v9 = vsel %vm265_vm0, %v744_v22, 0.0  ;;  %v832_v40 = vrot.slane %v831_v21, 4  ;;  %v746_v30 = vmul.f32 %v1652_v3, %v1481_v19  ;;  %1325 = vrcp.f32 %v681_v1 }
 0x1b5   : > { %v728_v27 = vadd.f32 %v727_v6, %v726_v39  ;;  %v717_v28 = vsel %vm265_vm0, %v1320_v37, 0.0  ;;  %v745_v10 = vmul.f32 %v1320_v37, %v1477_v18  ;;  %1327 = vrcp.f32 %v695_v31 }
 0x1b6   : > { %v709_v38 = vadd.f32 %v708_v23, %v707_v33  ;;  %v718_v62 = vrot.slane %v717_v28, 4  ;;  %v790_v25 = vrot.slane %v789_v4, 4  ;;  %v702_v29 = vadd.f32 %v701_v20, %v700_v5 }
 0x1b7   : > { %v820_v13 = vrot.slane %v819_v17, 2  ;;  %v715_v56 = vrot.slane %v714_v58, 1  ;;  %v845_v47 = vsel %vm265_vm0, %v745_v10, 0.0  ;;  %v839_v14 = vrot.slane %v838_v9, 4 }
 0x1b8   : > { %v833_v52 = vadd.f32 %v832_v40, %v831_v21  ;;  %v719_v46 = vadd.f32 %v718_v62, %v717_v28  ;;  %v852_v19 = vsel %vm265_vm0, %v746_v30, 0.0  ;;  %v1721_v3 = vpop.eup %1321  ;;  %v813_v50 = vrot.slane %v812_v60, 2 }
 0x1b9   : > { %v807_v15 = vadd.f32 %v806_v12, %v805_v53  ;;  %v827_v43 = vrot.slane %v826_v7, 2  ;;  %v729_v18 = vrot.slane %v728_v27, 1  ;;  %1329 = vrcp.f32 %v709_v38 }
 0x1ba   : > { %v720_v32 = vrot.slane %v719_v46, 2  ;;  %v846_v48 = vrot.slane %v845_v47, 4  ;;  %v796_v39 = vsel %vm265_vm0, %v1656_v41, 0.0  ;;  %1331 = vrcp.f32 %v702_v29 }
 0x1bb   : > { %v821_v55 = vadd.f32 %v820_v13, %v819_v17  ;;  %v716_v24 = vadd.f32 %v715_v56, %v714_v58  ;;  %v853_v57 = vrot.slane %v852_v19, 4  ;;  %v834_v5 = vrot.slane %v833_v52, 2 }
 0x1bc   : > { %v721_v33 = vadd.f32 %v720_v32, %v719_v46  ;;  %v840_v34 = vadd.f32 %v839_v14, %v838_v9  ;;  %v791_v0 = vadd.f32 %v790_v25, %v789_v4  ;;  %v814_v42 = vadd.f32 %v813_v50, %v812_v60 }
 0x1bd   : > { %v730_v22 = vadd.f32 %v729_v18, %v728_v27  ;;  %v779_v53 = vadd.f32 %v778_v36, %v1648_v61  ;;  %v797_v1 = vrot.slane %v796_v39, 4  ;;  %v808_v21 = vrot.slane %v807_v15, 1 }
 0x1be   : > { %v722_v6 = vrot.slane %v721_v33, 1  ;;  %v847_v31 = vadd.f32 %v846_v48, %v845_v47  ;;  %v785_v41 = vrot.slane %v1710_v51, 2  ;;  %1333 = vrcp.f32 %v716_v24 }
 0x1bf   : > { %v1324_v23 = vpop.eup %1323  ;;  %v822_v12 = vrot.slane %v821_v55, 1  ;;  %v828_v20 = vadd.f32 %v827_v43, %v826_v7  ;;  %v854_v17 = vadd.f32 %v853_v57, %v852_v19  ;;  %v835_v60 = vadd.f32 %v834_v5, %v833_v52 }
 0x1c0   : > { %v723_v4 = vadd.f32 %v722_v6, %v721_v33  ;;  %v841_v58 = vrot.slane %v840_v34, 2  ;;  %v792_v37 = vrot.slane %v791_v0, 2  ;;  %v815_v9 = vrot.slane %v814_v42, 1 }
 0x1c1   : > { %1335 = vrcp.f32 %v730_v22  ;;  %v774_v61 = vadd.f32 %v773_v16, %v1684_v59  ;;  %v798_v36 = vadd.f32 %v797_v1, %v796_v39  ;;  %v1326_v40 = vpop.eup %1325  ;;  %v809_v30 = vadd.f32 %v808_v21, %v807_v15 }
 0x1c2   : > { %1337 = vrcp.f32 %v723_v4  ;;  %v848_v27 = vrot.slane %v847_v31, 2  ;;  %v780_v28 = vrot.slane %v779_v53, 1  ;;  %v1328_v7 = vpop.eup %1327  ;;  %v823_v10 = vadd.f32 %v822_v12, %v821_v55 }
 0x1c3   : > { %v829_v38 = vrot.slane %v828_v20, 1  ;;  %v855_v62 = vrot.slane %v854_v17, 2  ;;  %1339 = vrcp.f32 %v1663_v8  ;;  %v836_v25 = vrot.slane %v835_v60, 1 }
 0x1c4   : > { %v842_v29 = vadd.f32 %v841_v58, %v840_v34  ;;  %v786_v13 = vadd.f32 %v785_v41, %v1710_v51  ;;  %v793_v56 = vadd.f32 %v792_v37, %v791_v0  ;;  %v816_v47 = vadd.f32 %v815_v9, %v814_v42 }
 0x1c5   : > { %v876_v59 = vmul.f32 %v1326_v40, %v809_v30  ;;  %v799_v16 = vrot.slane %v798_v36, 2  ;;  %v860_v14 = vmul.f32 %v1686_v49, %v1668_v11  ;;  %v849_v52 = vadd.f32 %v848_v27, %v847_v31 }
 0x1c6   : > { %v880_v46 = vmul.f32 %v1328_v7, %v823_v10  ;;  %v781_v19 = vadd.f32 %v780_v28, %v779_v53  ;;  %v864_v50 = vmul.f32 %v1698_v54, %v1690_v45  ;;  %v1330_v15 = vpop.eup %1329  ;;  %v830_v43 = vadd.f32 %v829_v38, %v828_v20  ;;  %v893_v10 = vld [vmem:[%s1787_s2 + $0x10] sm:$0xff]  ;;  %v894_v38 = vld [vmem:[%s1787_s2 + $0x18] sm:$0xff] }
 0x1c7   : > { %v856_v8 = vadd.f32 %v855_v62, %v854_v17  ;;  %v878_v18 = vmul.f32 %v1324_v23, %v816_v47  ;;  %v862_v51 = vmul.f32 %v1661_v26, %v1681_v44  ;;  %v1332_v32 = vpop.eup %1331  ;;  %v837_v48 = vadd.f32 %v836_v25, %v835_v60 }
 0x1c8   : > { %v843_v39 = vrot.slane %v842_v29, 1  ;;  %v787_v55 = vrot.slane %v786_v13, 1  ;;  %v794_v24 = vrot.slane %v793_v56, 1  ;;  %v800_v49 = vadd.f32 %v799_v16, %v798_v36 }
 0x1c9   : > { %v949_v11 = vsel %vm935_vm1, %v878_v18, %v876_v59  ;;  %v868_v57 = vmul.f32 %v1702_v2, %v781_v19  ;;  %v936_v33 = vsel %vm935_vm1, %v862_v51, %v860_v14  ;;  %v850_v45 = vrot.slane %v849_v52, 1 }
 0x1ca   : > { %v884_v54 = vmul.f32 %v1330_v15, %v837_v48  ;;  %v950_v5 = vsel %vm937_vm2, %v880_v46, %v949_v11  ;;  %v938_v34 = vsel %vm937_vm2, %v864_v50, %v936_v33  ;;  %v857_v0 = vrot.slane %v856_v8, 1 }
 0x1cb   : > { %v882_v26 = vmul.f32 %v1332_v32, %v830_v43  ;;  %v866_v44 = vmul.f32 %v1693_v35, %v774_v61  ;;  %v1334_v42 = vpop.eup %1333  ;;  %v844_v22 = vadd.f32 %v843_v39, %v842_v29  ;;  %v795_v53 = vadd.f32 %v794_v24, %v793_v56 }
 0x1cc   : > { %v788_v2 = vadd.f32 %v787_v55, %v786_v13  ;;  %v801_v21 = vrot.slane %v800_v49, 1  ;;  %v851_v41 = vadd.f32 %v850_v45, %v849_v52  ;;  %v858_v4 = vadd.f32 %v857_v0, %v856_v8 }
 0x1cd   : > { %v951_v1 = vsel %vm939_vm3, %v882_v26, %v950_v5  ;;  %v940_v6 = vsel %vm939_vm3, %v866_v44, %v938_v34  ;;  %v872_v12 = vmul.f32 %v1721_v3, %v795_v53  ;;  %v886_v60 = vmul.f32 %v1334_v42, %v844_v22 }
 0x1ce   : > { %v1336_v31 = vpop.eup %1335  ;;  %v952_v23 = vsel %vm941_vm4, %v884_v54, %v951_v1  ;;  %v942_v20 = vsel %vm941_vm4, %v868_v57, %v940_v6  ;;  %v870_v35 = vmul.f32 %v1700_v63, %v788_v2  ;;  %v802_v36 = vadd.f32 %v801_v21, %v800_v49  ;;  %v892_v63 = vld [vmem:[%s1787_s2 + $0x8] sm:$0xff] }
 0x1cf   : > { %v1338_v17 = vpop.eup %1337  ;;  %v890_v9 = vmul.f32 %v1336_v31, %v858_v4  ;;  %v953_v61 = vsel %vm943_vm5, %v886_v60, %v952_v23 }
 0x1d0   : > { %v1340_v58 = vpop.eup %1339  ;;  %v888_v37 = vmul.f32 %v1338_v17, %v851_v41  ;;  %v944_v40 = vsel %vm943_vm5, %v870_v35, %v942_v20 }
 0x1d1   : > { %v946_v27 = vsel %vm945_vm6, %v872_v12, %v944_v40  ;;  %v874_v28 = vmul.f32 %v1340_v58, %v802_v36 }
 0x1d2   : > { %v954_v30 = vsel %vm945_vm6, %v888_v37, %v953_v61 }
 0x1d3   : > { %v955_v3 = vsel %vm947_vm7, %v890_v9, %v954_v30  ;;  %v948_v7 = vsel %vm947_vm7, %v874_v28, %v946_v27 }
 0x1d4   : > { %1235 = vmatprep.subr.msk.mxu1 %vm265_vm0, %v955_v3  ;;  %v902_v62 = vpop.permute.xlu1 %901 }
 0x1d5   : > { %1236 = vmatpush3.xpose.msk.msra.mxu1 %vm265_vm0, %v955_v3  ;;  %v912_v52 = vpop.permute.xlu0 %911 }
 0x1d6   : > { %1237 = vmatprep.subr.msk.mxu1 %vm265_vm0, %v948_v7 }
 0x1d8   : > { %v907_v25 = vpop.permute.xlu1 %906 }
 0x1d9   : > { %1238 = vmatpush3.xpose.msk.msra.mxu1 %vm265_vm0, %v948_v7 }
 0x1dc   : > { %1240 = vmatmul.mubr.msk.f32.vlgmr.msra.gmra.mxu1 %vm265_vm0, %v892_v63  ;;  %v917_v16 = vpop.permute.xlu1 %916 }
 0x1dd   : > { %1242 = vmatprep.mubr.msk.f32.mxu1 %vm265_vm0, %v893_v10 }
 0x1e0   : > { %1243 = vmatmul.mubr.msk.f32.gmra.mxu1 %vm265_vm0, %v894_v38 }
 0x29c   : > { %v1241_v29 = vpop.f32.mrf.mxu1 }
 0x29d   : > { %v1044_v13 = vadd.f32 %v1241_v29, %v907_v25 }
 0x29e   : > { %v1038_v56 = vpop.f32.mrf.mxu1 }
 0x29f   : > { %v1058_v47 = vmax.f32 %v1044_v13, 0.0  ;;  %v1039_v59 = vadd.f32 %v1038_v56, %v902_v62 }
 0x2a0   : > { %v1244_v14 = vpop.f32.mrf.mxu1 }
 0x2a1   : > { %1062 = vst.msk [vmem:[%s228_s24 + $0x8] sm:$0xff] %vm265_vm0, %v1058_v47  ;;  %v1057_v46 = vmax.f32 %v1039_v59, 0.0  ;;  %v1054_v19 = vadd.f32 %v1244_v14, %v917_v16 }
 0x2a2   : > { %v1048_v50 = vpop.f32.mrf.mxu1 }
 0x2a3   : > { %1061 = vst.msk [vmem:[%s228_s24] sm:$0xff] %vm265_vm0, %v1057_v46  ;;  %v1060_v15 = vmax.f32 %v1054_v19, 0.0  ;;  %v1049_v43 = vadd.f32 %v1048_v50, %v912_v52 }
 0x2a5   : > { %1064 = vst.msk [vmem:[%s228_s24 + $0x18] sm:$0xff] %vm265_vm0, %v1060_v15  ;;  %v1059_v8 = vmax.f32 %v1049_v43, 0.0 }
 0x2a7   : > { %1063 = vst.msk [vmem:[%s228_s24 + $0x10] sm:$0xff] %vm265_vm0, %v1059_v8 }
 0x2a8 PF: > { %s14_s17 = sadd.s32 1, %s1363_s17   ;;  %s1790_s15 = smov %s1359_s16 }
 0x2a9   : > { %p11_p5 = scmp.ge.s32.totalorder %s14_s17, 4   ;;  %s1791_s16 = smov %s1793_s18 }
 0x2ab   :  { %13 = sbr.rel (!%p11_p5) target bundleno = 2 (0x2), region = 66 }

</bundles_post_ra>
